<compile_context>
chip_gen: v7x
topology: tpu7x:2x2x1
jax: 0.10.0
libtpu: 0.0.40
codegen_flags: <defaults>
</compile_context>

<pallas_src>
import jax
import jax.numpy as jnp
from jax.experimental import pallas as pl
from jax.experimental.pallas import tpu as pltpu

_MIB = 1024 * 1024


def _round_up(x, m):
    return ((x + m - 1) // m) * m


def _sublane(dtype):
    # Sublane (second-to-last dim) granularity by element size.
    return {4: 8, 2: 16, 1: 32}.get(jnp.dtype(dtype).itemsize, 8)


def _vmem_info():
    """Return (physical VMEM bytes, vmem_limit_bytes to request)."""
    cap = None
    try:
        cap = getattr(pltpu.get_tpu_info(), "vmem_capacity_bytes", None)
    except Exception:
        cap = None
    if not cap:
        cap = 64 * _MIB                       # conservative (v7x-class, 64 MiB/TC)
    if cap >= 100 * _MIB:                     # v5e / v6e: 128 MiB physical
        return cap, 100 * _MIB
    return cap, min(48 * _MIB, (cap * 3) // 4)  # v7x-class


def _default_tiles(itemsize, big_vmem):
    """(tm, tn, tk) defaults per generation / input dtype width."""
    if big_vmem:                              # v5e / v6e
        if itemsize >= 4:
            return 512, 1024, 2048            # f32
        return 512, 2048, 2048                # bf16 (and narrower)
    return 512, 1024, 1024                    # v7x-class: working set stays < ~20 MiB


def _choose_k_tiling(K, tk_max):
    """Pick (tk, Kp): Kp is the minimally zero-padded K such that tk | Kp."""
    kp_min = _round_up(K, 128)
    if kp_min <= tk_max:
        return K, K                           # single reduction step, no padding
    Kp = kp_min
    tk = max(128, (tk_max // 128) * 128)
    while Kp % tk:                            # largest multiple-of-128 divisor <= tk_max
        tk -= 128
    return tk, Kp


def _linear_kernel_direct(x_ref, w_ref, b_ref, o_ref):
    # f32 output path: accumulate straight into the VMEM-resident output tile.
    k = pl.program_id(2)
    part = jnp.dot(x_ref[...], w_ref[...], preferred_element_type=jnp.float32)

    @pl.when(k == 0)
    def _():
        o_ref[...] = part                     # direct store: no zero-init RMW pass

    @pl.when(k > 0)
    def _():
        o_ref[...] += part

    @pl.when(k == pl.num_programs(2) - 1)
    def _():
        o_ref[...] += b_ref[...].astype(jnp.float32)   # fused bias, applied once


def _linear_kernel_acc(x_ref, w_ref, b_ref, o_ref, acc_ref):
    # Narrow-output path (e.g. bf16): f32 scratch accumulator, cast on finalize.
    k = pl.program_id(2)
    part = jnp.dot(x_ref[...], w_ref[...], preferred_element_type=jnp.float32)

    @pl.when(k == 0)
    def _():
        acc_ref[...] = part

    @pl.when(k > 0)
    def _():
        acc_ref[...] += part

    @pl.when(k == pl.num_programs(2) - 1)
    def _():
        o_ref[...] = (acc_ref[...] + b_ref[...].astype(jnp.float32)).astype(o_ref.dtype)


def linear(x, w, b, *, tm=None, tn=None, tk=None):
    """y = x @ w + b via a tiled Pallas TPU kernel (K-innermost reduction)."""
    M, K = x.shape
    K2, N = w.shape
    assert K == K2 and b.shape == (N,)
    out_dtype = jnp.result_type(x.dtype, w.dtype, b.dtype)

    itemsize = jnp.dtype(x.dtype).itemsize
    sub = _sublane(x.dtype)
    vmem_cap, vmem_limit = _vmem_info()
    big_vmem = vmem_cap >= 100 * _MIB

    dtm, dtn, dtk = _default_tiles(itemsize, big_vmem)
    tm = dtm if tm is None else tm
    tn = dtn if tn is None else tn
    tk = dtk if tk is None else tk

    # Clamp tiles to the problem size.  M/N are NOT padded: edge blocks that
    # overhang the array rely on Pallas' partial-block masking on writeback.
    tm = _round_up(min(tm, _round_up(M, sub)), sub)
    tn = _round_up(min(tn, _round_up(N, 128)), 128)

    # v7x-class chips have 2 TensorCores: keep >=2 "parallel" grid steps.
    if not big_vmem and pl.cdiv(M, tm) * pl.cdiv(N, tn) < 2:
        if N >= 256:
            tn = _round_up(-(-N // 2), 128)
        elif M >= 2 * sub:
            tm = _round_up(-(-M // 2), sub)

    # Reduction axis: tk always divides the (minimally) padded K, so padded
    # columns are exact zeros and contribute nothing.
    tk, Kp = _choose_k_tiling(K, max(int(tk), 128))
    if Kp != K:
        x = jnp.pad(x, ((0, 0), (0, Kp - K)))
        w = jnp.pad(w, ((0, Kp - K), (0, 0)))

    b2d = b.reshape(1, N)

    grid = (pl.cdiv(M, tm), pl.cdiv(N, tn), Kp // tk)

    in_specs = [
        pl.BlockSpec((tm, tk), lambda i, j, k: (i, k)),   # x tile
        pl.BlockSpec((tk, tn), lambda i, j, k: (k, j)),   # w tile
        pl.BlockSpec((1, tn), lambda i, j, k: (0, j)),    # bias tile (lane-dense)
    ]
    out_specs = pl.BlockSpec((tm, tn), lambda i, j, k: (i, j))

    if out_dtype == jnp.float32:
        kernel = _linear_kernel_direct
        scratch_shapes = []
    else:
        kernel = _linear_kernel_acc
        scratch_shapes = [pltpu.VMEM((tm, tn), jnp.float32)]

    return pl.pallas_call(
        kernel,
        out_shape=jax.ShapeDtypeStruct((M, N), out_dtype),
        grid_spec=pltpu.PrefetchScalarGridSpec(
            num_scalar_prefetch=0,
            grid=grid,
            in_specs=in_specs,
            out_specs=out_specs,
            scratch_shapes=scratch_shapes,
        ),
        compiler_params=pltpu.CompilerParams(
            # i/j parallel (megacore / 2-TC sharding), K reduction arbitrary.
            dimension_semantics=("parallel", "parallel", "arbitrary"),
            vmem_limit_bytes=vmem_limit,
        ),
    )(x, w, b2d)


if __name__ == "__main__":
    key = jax.random.PRNGKey(0)

    # --- Case 1: module's own shapes (batch=8, in_feature=32, out_feature=128).
    M, in_feature, out_feature = 8, 32, 128
    kx, kw, kb = jax.random.split(key, 3)
    x = jax.random.normal(kx, (M, in_feature), dtype=jnp.float32)
    w = jax.random.normal(kw, (in_feature, out_feature), dtype=jnp.float32)
    b = jax.random.normal(kb, (out_feature,), dtype=jnp.float32)

    out = linear(x, w, b)
    jax.block_until_ready(out)
    ref = x @ w + b
    assert out.shape == (M, out_feature)
    assert jnp.allclose(out, ref, atol=1e-4, rtol=1e-4)

    # --- Case 2: multi-tile grid with K accumulation + non-dividing M/N edge blocks (f32).
    M2, K2, N2 = 200, 384, 300
    k1, k2, k3 = jax.random.split(jax.random.PRNGKey(1), 3)
    x2 = jax.random.normal(k1, (M2, K2), dtype=jnp.float32)
    w2 = jax.random.normal(k2, (K2, N2), dtype=jnp.float32)
    b2 = jax.random.normal(k3, (N2,), dtype=jnp.float32)
    out2 = linear(x2, w2, b2, tm=128, tn=128, tk=128)   # grid (2, 3, 3), edge blocks partial
    jax.block_until_ready(out2)
    ref2 = x2 @ w2 + b2
    assert jnp.allclose(out2, ref2, atol=1e-3, rtol=1e-3)

    # --- Case 3: unaligned bf16 inputs (f32 scratch-accumulator path, no padding at all).
    M3, K3, N3 = 100, 96, 200
    k4, k5, k6 = jax.random.split(jax.random.PRNGKey(2), 3)
    x3 = jax.random.normal(k4, (M3, K3), dtype=jnp.float32).astype(jnp.bfloat16)
    w3 = jax.random.normal(k5, (K3, N3), dtype=jnp.float32).astype(jnp.bfloat16)
    b3 = jax.random.normal(k6, (N3,), dtype=jnp.float32).astype(jnp.bfloat16)
    out3 = linear(x3, w3, b3)
    jax.block_until_ready(out3)
    ref3 = x3.astype(jnp.float32) @ w3.astype(jnp.float32) + b3.astype(jnp.float32)
    assert out3.shape == (M3, N3)
    assert jnp.allclose(out3.astype(jnp.float32), ref3, atol=2e-1, rtol=2e-2)

    print("KERNEL_OK")
</pallas_src>

<mosaic_0001>
module attributes {stable_mosaic.version = 11 : i64} {
  func.func @_linear_kernel_direct(%arg0: i32, %arg1: i32, %arg2: i32, %arg3: memref<8x32xf32, #tpu.memory_space<vmem>>, %arg4: memref<32x128xf32, #tpu.memory_space<vmem>>, %arg5: memref<1x128xf32, #tpu.memory_space<vmem>>, %arg6: memref<8x128xf32, #tpu.memory_space<vmem>>) attributes {dimension_semantics = [#tpu.dimension_semantics<parallel>, #tpu.dimension_semantics<parallel>, #tpu.dimension_semantics<arbitrary>], iteration_bounds = array<i64: 1, 1, 1>, scalar_prefetch = 0 : i64, scratch_operands = 0 : i64, tpu.core_type = #tpu.core_type<tc>, window_params = [{transform_indices = @transform_0, window_bounds = array<i64: 8, 32>}, {transform_indices = @transform_1, window_bounds = array<i64: 32, 128>}, {transform_indices = @transform_2, window_bounds = array<i64: 1, 128>}, {transform_indices = @transform_3, window_bounds = array<i64: 8, 128>}]} {
    %c0 = arith.constant 0 : index
    %c0_0 = arith.constant 0 : index
    %0 = vector.load %arg3[%c0, %c0_0] : memref<8x32xf32, #tpu.memory_space<vmem>>, vector<8x32xf32>
    %c0_1 = arith.constant 0 : index
    %c0_2 = arith.constant 0 : index
    %1 = vector.load %arg4[%c0_1, %c0_2] : memref<32x128xf32, #tpu.memory_space<vmem>>, vector<32x128xf32>
    %cst = arith.constant dense<0.000000e+00> : vector<8x128xf32>
    %2 = tpu.matmul %0, %1, %cst {dimension_numbers = #tpu.dot_dimension_numbers<[1], [0], [0], [1], [0, 0, 1, 1], [], []>} : vector<8x32xf32>, vector<32x128xf32>, vector<8x128xf32> -> vector<8x128xf32>
    %c0_i32 = arith.constant 0 : i32
    %3 = arith.cmpi eq, %arg2, %c0_i32 : i32
    %4 = arith.extui %3 : i1 to i32
    %c0_i32_3 = arith.constant 0 : i32
    %5 = arith.cmpi ne, %4, %c0_i32_3 : i32
    scf.if %5 {
      %c0_8 = arith.constant 0 : index
      %c0_9 = arith.constant 0 : index
      %12 = vector.load %arg6[%c0_8, %c0_9] : memref<8x128xf32, #tpu.memory_space<vmem>>, vector<8x128xf32>
      tpu.vector_store %arg6[%c0_8, %c0_9], %2 {strides = array<i32>} : memref<8x128xf32, #tpu.memory_space<vmem>>, vector<8x128xf32>,
    } else {
    }
    %c0_i32_4 = arith.constant 0 : i32
    %6 = arith.cmpi sgt, %arg2, %c0_i32_4 : i32
    %7 = arith.extui %6 : i1 to i32
    %c0_i32_5 = arith.constant 0 : i32
    %8 = arith.cmpi ne, %7, %c0_i32_5 : i32
    scf.if %8 {
      %c0_8 = arith.constant 0 : index
      %c0_9 = arith.constant 0 : index
      %12 = vector.load %arg6[%c0_8, %c0_9] : memref<8x128xf32, #tpu.memory_space<vmem>>, vector<8x128xf32>
      %13 = arith.addf %12, %2 : vector<8x128xf32>
      %c0_10 = arith.constant 0 : index
      %c0_11 = arith.constant 0 : index
      %14 = vector.load %arg6[%c0_10, %c0_11] : memref<8x128xf32, #tpu.memory_space<vmem>>, vector<8x128xf32>
      tpu.vector_store %arg6[%c0_10, %c0_11], %13 {strides = array<i32>} : memref<8x128xf32, #tpu.memory_space<vmem>>, vector<8x128xf32>,
    } else {
    }
    %c0_i32_6 = arith.constant 0 : i32
    %9 = arith.cmpi eq, %arg2, %c0_i32_6 : i32
    %10 = arith.extui %9 : i1 to i32
    %c0_i32_7 = arith.constant 0 : i32
    %11 = arith.cmpi ne, %10, %c0_i32_7 : i32
    scf.if %11 {
      %c0_8 = arith.constant 0 : index
      %c0_9 = arith.constant 0 : index
      %12 = vector.load %arg6[%c0_8, %c0_9] : memref<8x128xf32, #tpu.memory_space<vmem>>, vector<8x128xf32>
      %c0_10 = arith.constant 0 : index
      %c0_11 = arith.constant 0 : index
      %13 = vector.load %arg5[%c0_10, %c0_11] : memref<1x128xf32, #tpu.memory_space<vmem>>, vector<1x128xf32>
      %14 = vector.broadcast %13 : vector<1x128xf32> to vector<8x128xf32>
      %15 = arith.addf %12, %14 : vector<8x128xf32>
      %c0_12 = arith.constant 0 : index
      %c0_13 = arith.constant 0 : index
      %16 = vector.load %arg6[%c0_12, %c0_13] : memref<8x128xf32, #tpu.memory_space<vmem>>, vector<8x128xf32>
      tpu.vector_store %arg6[%c0_12, %c0_13], %15 {strides = array<i32>} : memref<8x128xf32, #tpu.memory_space<vmem>>, vector<8x128xf32>,
    } else {
    }
    return
  }
  func.func @transform_0(%arg0: i32, %arg1: i32, %arg2: i32) -> (i32, i32) {
    %c0_i32 = arith.constant 0 : i32
    return %arg0, %arg2 : i32, i32
  }
  func.func @transform_1(%arg0: i32, %arg1: i32, %arg2: i32) -> (i32, i32) {
    %c0_i32 = arith.constant 0 : i32
    return %arg2, %arg1 : i32, i32
  }
  func.func @transform_2(%arg0: i32, %arg1: i32, %arg2: i32) -> (i32, i32) {
    %c0_i32 = arith.constant 0 : i32
    %c0_i32_0 = arith.constant 0 : i32
    return %c0_i32, %arg1 : i32, i32
  }
  func.func @transform_3(%arg0: i32, %arg1: i32, %arg2: i32) -> (i32, i32) {
    %c0_i32 = arith.constant 0 : i32
    return %arg0, %arg1 : i32, i32
  }
}

</mosaic_0001>

<bundles_post_ra>
// kernel: tpu_custom_call.1
= control target key start
LH: loop header
LB: loop body
LE: loop exit
PB: predicated region body
PF: predicated region fallthrough
CT: control target
= control target key end

     0   :  { %8 = vsyncpa [#allocation3], 0  ;;  %s339_s0 = inlined_call_operand.hbm [shape: f32[8,32], index: 0, kind: input, shape index: {}]   ;;  %s340_s1 = inlined_call_operand.hbm [shape: f32[32,128], index: 1, kind: input, shape index: {}]   ;;  %s341_s2 = inlined_call_operand.vmem [shape: f32[1,128], index: 2, kind: input, shape index: {}]   ;;  %s342_s3 = inlined_call_operand.hbm [shape: f32[8,128], index: 3, kind: output, shape index: {}]  }
   0x1   :  { %9 = vsyncpa [#allocation6], 0 }
   0x2   :  { %10 = vsyncpa [#allocation4], 0  ;;  %s265_s12 = smov [#allocation2]   ;;  %s266_s14 = smov [#allocation5]  }
   0x3   :  { %s17_s13 = sshll.u32 %s265_s12, 4  ;;  %s26_s15 = sshll.u32 %s266_s14, 4  ;;  %s18_s13 = int_to_ptr.vmem [resolvable:$true] %s17_s13  ;;  %s293_s15 = int_to_ptr.vmem [resolvable:$true] %s26_s15 }
   0x4   :  { %s193_s18 = scalar_lea.hbm %s339_s0, 128 }
   0x5   :  { %p194_p0 = scmp.ne.s32.totalorder %s339_s0, %s193_s18  ;;  %p197_p1 = scmp.lt.u32.totalorder %s193_s18, %s339_s0 }
   0x7   :  { %p199_p2 = pnand %p197_p1, %p194_p0 }
   0x9   :  { %202 = shalt.err (!%p199_p2)
}
   0xa   :  { %s203_s23 = scalar_lea.vmem %s18_s13, 128  ;;  %p208_p4 = scmp.lt.s32.totalorder %s18_s13, %s18_s13 }
   0xb   :  { %p204_p3 = scmp.ne.s32.totalorder %s18_s13, %s203_s23  ;;  %p209_p5 = scmp.lt.s32.totalorder %s203_s23, %s203_s23 }
   0xd   :  { %p210_p6 = por %p209_p5, %p208_p4 }
   0xf   :  { %p211_p7 = pnand %p210_p6, %p204_p3 }
  0x11   :  { %214 = shalt.err (!%p211_p7)
}
  0x12   :  { %20 = dma.hbm_to_vmem [thread:$0]  %s339_s0, 128, %s18_s13, [#allocation3]  }
  0x13   :  { %s215_s28 = scalar_lea.hbm %s340_s1, 512 }
  0x14   :  { %p216_p8 = scmp.ne.s32.totalorder %s340_s1, %s215_s28  ;;  %p219_p9 = scmp.lt.u32.totalorder %s215_s28, %s340_s1 }
  0x16   :  { %p221_p10 = pnand %p219_p9, %p216_p8 }
  0x18   :  { %224 = shalt.err (!%p221_p10)
}
  0x19   :  { %s225_s6 = scalar_lea.vmem %s293_s15, 512  ;;  %p230_p12 = scmp.lt.s32.totalorder %s293_s15, %s293_s15 }
  0x1a   :  { %p226_p11 = scmp.ne.s32.totalorder %s293_s15, %s225_s6  ;;  %p231_p13 = scmp.lt.s32.totalorder %s225_s6, %s225_s6 }
  0x1c   :  { %p232_p0 = por %p231_p13, %p230_p12 }
  0x1e   :  { %p233_p1 = pnand %p232_p0, %p226_p11 }
  0x20   :  { %236 = shalt.err (!%p233_p1)
}
  0x21   :  { %s267_s0 = smov 128   ;;  %s268_s7 = smov 8  }
  0x22   :  { %32 = dma.hbm_to_vmem [thread:$0]  %s340_s1, 512, %s293_s15, [#allocation6], %s267_s0, %s267_s0, %s268_s7  }
  0x23   :  { %259 = dma.done.wait [#allocation3], 128  }
  0x24   :  { %260 = vsyncadd [#allocation3], 4294967168 }
  0x25   :  { %261 = dma.done.wait [#allocation6], 512  }
  0x26   :  { %262 = vsyncadd [#allocation6], 4294966784  ;;  %v269_v0 = vmov 0.0|0.0   ;;  %vm270_vm0 = vmmov 0   ;;  %v271_v1 = vmov 0.0   ;;  %v42_v2 = vld [vmem:[#allocation5] sm:$0xff] }
  0x27   :  { %179 = vmatprep.subr.bf16.mxu0 %v269_v0  ;;  %176 = vmatprep.mubr.msk.f32.mxu0 %vm270_vm0, %v271_v1  ;;  %v43_v3 = vld [vmem:[#allocation5 + $0x8] sm:$0xff]  ;;  %v44_v4 = vld [vmem:[#allocation5 + $0x10] sm:$0xff]  ;;  %v45_v6 = vld [vmem:[#allocation5 + $0x18] sm:$0xff]  ;;  %vm46_vm1 = vcmask 261120   ;;  %s272_s11 = smov [#allocation7]  }
  0x28   :  { %v180_v5 = vpack.c.bf16 %v43_v3, %v42_v2  ;;  %v183_v7 = vpack.c.bf16 %v45_v6, %v44_v4  ;;  %v41_v8 = vld [vmem:[#allocation2] sm:$0xff]  ;;  %s151_s12 = sshll.u32 %s272_s11, 4  ;;  %s152_s12 = int_to_ptr.vmem [resolvable:$true] %s151_s12 }
  0x29   :  { %v162_v9 = vld [vmem:[%s341_s2] ss:$0 sm:$0xff]  ;;  %s237_s13 = scalar_lea.vmem %s152_s12, 128  ;;  %p242_p3 = scmp.lt.s32.totalorder %s152_s12, %s152_s12 }
  0x2a   :  { %181 = vmatpush3.bf16.msra.mxu0 %v180_v5  ;;  %p238_p2 = scmp.ne.s32.totalorder %s152_s12, %s237_s13  ;;  %p243_p4 = scmp.lt.s32.totalorder %s237_s13, %s237_s13 }
  0x2b   :  { %182 = vmatprep.subr.bf16.mxu0 %v269_v0 }
  0x2c   :  { %p244_p5 = por %p243_p4, %p242_p3 }
  0x2e   :  { %184 = vmatpush3.bf16.msra.mxu0 %v183_v7  ;;  %p245_p6 = pnand %p244_p5, %p238_p2 }
  0x31   :  { %177 = vmatmul.mubr.msk.f32.vlgmr.msra.gmra.mrb[0].mxu0 %vm46_vm1, %v41_v8 }
 0x104   :  { %v116_v10 = vpop.f32.mrb[0].mxu0 }
 0x105   :  { %v178_v11 = vpop.f32.mrb[1].mxu0  ;;  %v143_v12 = vadd.f32 %v162_v9, %v116_v10 }
 0x107   :  { %144 = vst [vmem:[#allocation7] sm:$0xff] %v143_v12 }
 0x108   :  { %248 = shalt.err (!%p245_p6)
}
 0x109   :  { %s249_s16 = scalar_lea.hbm %s342_s3, 128 }
 0x10a   :  { %p250_p7 = scmp.ne.s32.totalorder %s342_s3, %s249_s16  ;;  %p253_p8 = scmp.lt.u32.totalorder %s249_s16, %s342_s3 }
 0x10c   :  { %p255_p9 = pnand %p253_p8, %p250_p7 }
 0x10e   :  { %258 = shalt.err (!%p255_p9)
}
 0x10f   :  { %154 = dma.vmem_to_hbm [thread:$0]  %s152_s12, 128, %s342_s3, [#allocation4]  }
 0x110   :  { %263 = dma.done.wait [#allocation4], 128  }
 0x111   :  { %264 = vsyncadd [#allocation4], 4294967168 }
 0x112   :  { %158 = vsyncpa [#allocation3], 1 }
 0x113   :  { %159 = vsyncpa [#allocation6], 1 }
 0x114   :  { %160 = vsyncpa [#allocation4], 1 }

</bundles_post_ra>
